<compile_context>
chip_gen: v6e
topology: v6e:2x2x1
jax: 0.10.0
libtpu: 0.0.40
codegen_flags: <defaults>
</compile_context>

<pallas_src>
import functools

import jax
import jax.numpy as jnp
from jax.experimental import pallas as pl
from jax.experimental.pallas import tpu as pltpu


def _round_up(x, m):
    return ((x + m - 1) // m) * m


def _mlp_kernel(x_ref, w1_ref, b1_ref, w2_ref, b2_ref, w3_ref, b3_ref, ot_ref):
    """One batch tile of the 3-layer MLP with feature-major intermediates.

    x_ref : (bm, d_in)  f32   natural (batch-major) input tile
    w1    : (F, d_in)         b1: (F, 1)
    w2    : (F, F)            b2: (F, 1)
    w3    : (d_out, F)        b3: (d_out, 1)
    ot_ref: (d_out, bm) f32   feature-major output (lane-dense along batch)
    """
    # Layer 1: (F, d_in) @ (d_in, bm) -> (F, bm).  The small (bm, d_in) operand
    # is consumed transposed (same pattern as q @ k.T in attention kernels).
    h1 = jnp.dot(w1_ref[...], x_ref[...].T, preferred_element_type=jnp.float32)
    h1 = jnp.maximum(h1 + b1_ref[...], 0.0)

    # Layer 2: (F, F) @ (F, bm) -> (F, bm), f32 accumulate on the MXU.
    h2 = jnp.dot(w2_ref[...], h1, preferred_element_type=jnp.float32)
    h2 = jnp.maximum(h2 + b2_ref[...], 0.0)

    # Layer 3: (d_out, F) @ (F, bm) -> (d_out, bm); sigmoid runs on the EUP.
    logits = jnp.dot(w3_ref[...], h2, preferred_element_type=jnp.float32)
    ot_ref[...] = jax.nn.sigmoid(logits + b3_ref[...]).astype(ot_ref.dtype)


def _vmem_budget_bytes():
    """Generation-aware VMEM budget: ~80% of physical capacity, safe fallback."""
    try:
        cap = int(pltpu.get_tpu_info().vmem_capacity_bytes)
    except Exception:
        cap = 64 * 1024 * 1024  # conservative: v7x physical VMEM per TensorCore
    return int(cap * 0.8)


def _bytes_per_row(d_in, filter_size, d_out):
    # Resident f32 bytes per batch row inside one grid step:
    # double-buffered x/out tiles + the two (F, bm) intermediates, 1.5x slack.
    return int((2 * d_in + 2 * d_out + 2 * filter_size) * 4 * 1.5)


def _choose_block_m(n, block_m, budget_bytes, d_in, filter_size, d_out):
    """Lane-dense batch tile: multiple of 128, amortizes the ~600-cycle grid-step
    overhead, fits the VMEM budget, and (when N allows) yields >= 2 grid steps so
    the 'parallel' axis can feed both v7x TensorCores."""
    vmem_rows = max(128, (budget_bytes // _bytes_per_row(d_in, filter_size, d_out))
                    // 128 * 128)
    n128 = _round_up(max(n, 1), 128)
    bm = min(_round_up(max(block_m, 128), 128), vmem_rows)
    if n128 <= bm:
        # Would be a single grid step: split into two tiles when possible.
        bm = max(128, min(bm, _round_up((n128 + 1) // 2, 128)))
    return bm


@functools.partial(jax.jit, static_argnames=("block_m",))
def model_2d_forward(x, w1, b1, w2, b2, w3, b3, *, block_m=8192):
    """x: (N, d_in) f32.  Weights in PyTorch nn.Linear layout:
    w1: (F, d_in), b1: (F,), w2: (F, F), b2: (F,), w3: (3, F), b3: (3,).
    Returns (N, 3) f32."""
    # TODO(synk): the PyTorch module rebuilds layer1 when x.shape[1] changes at
    # runtime (Python-side module mutation); not expressible in a kernel — the
    # caller must pass weights whose in_features match x.
    n, d_in = x.shape
    filter_size = w1.shape[0]
    d_out = w3.shape[0]

    budget = _vmem_budget_bytes()
    bm = _choose_block_m(n, block_m, budget, d_in, filter_size, d_out)
    # Non-divisible batch tail is handled by Pallas boundary masking (no jnp.pad).
    grid = (pl.cdiv(n, bm),)

    # Column-vector biases broadcast along the lane (batch) axis inside the kernel.
    b1c = b1.reshape(filter_size, 1).astype(jnp.float32)
    b2c = b2.reshape(filter_size, 1).astype(jnp.float32)
    b3c = b3.reshape(d_out, 1).astype(jnp.float32)

    weights_bytes = 4 * (filter_size * (d_in + filter_size + d_out)
                         + 2 * filter_size + d_out)
    est = _bytes_per_row(d_in, filter_size, d_out) * bm + 4 * weights_bytes
    vmem_limit = max(32 * 1024 * 1024, min(est, budget))

    out_t = pl.pallas_call(
        _mlp_kernel,
        out_shape=jax.ShapeDtypeStruct((d_out, n), jnp.float32),
        grid_spec=pltpu.PrefetchScalarGridSpec(
            num_scalar_prefetch=0,
            grid=grid,
            in_specs=[
                pl.BlockSpec((bm, d_in), lambda i: (i, 0)),                  # x tile
                pl.BlockSpec((filter_size, d_in), lambda i: (0, 0)),         # W1 (resident)
                pl.BlockSpec((filter_size, 1), lambda i: (0, 0)),            # b1
                pl.BlockSpec((filter_size, filter_size), lambda i: (0, 0)),  # W2 (resident)
                pl.BlockSpec((filter_size, 1), lambda i: (0, 0)),            # b2
                pl.BlockSpec((d_out, filter_size), lambda i: (0, 0)),        # W3 (resident)
                pl.BlockSpec((d_out, 1), lambda i: (0, 0)),                  # b3
            ],
            out_specs=pl.BlockSpec((d_out, bm), lambda i: (0, i)),           # lane-dense
        ),
        compiler_params=pltpu.CompilerParams(
            dimension_semantics=("parallel",),
            vmem_limit_bytes=vmem_limit,
        ),
    )(x.astype(jnp.float32), w1.astype(jnp.float32), b1c,
      w2.astype(jnp.float32), b2c, w3.astype(jnp.float32), b3c)

    # TODO(synk): consumers that can take the feature-major (3, N) result should
    # skip this final transpose (it is a small strided XLA copy, ~24 B/row).
    return out_t.T


def init_params(key, d_in=26, filter_size=128, d_out=3, dtype=jnp.float32):
    """Deterministic PyTorch-Linear-style init: U(-1/sqrt(fan_in), 1/sqrt(fan_in)),
    weights stored in PyTorch layout (out_features, in_features)."""
    ks = jax.random.split(key, 6)

    def uniform(k, shape, fan_in):
        bound = 1.0 / jnp.sqrt(jnp.float32(fan_in))
        return jax.random.uniform(k, shape, dtype, minval=-bound, maxval=bound)

    w1 = uniform(ks[0], (filter_size, d_in), d_in)
    b1 = uniform(ks[1], (filter_size,), d_in)
    w2 = uniform(ks[2], (filter_size, filter_size), filter_size)
    b2 = uniform(ks[3], (filter_size,), filter_size)
    w3 = uniform(ks[4], (d_out, filter_size), filter_size)
    b3 = uniform(ks[5], (d_out,), filter_size)
    return w1, b1, w2, b2, w3, b3


def reference_forward(x, w1, b1, w2, b2, w3, b3):
    h1 = jnp.maximum(x @ w1.T + b1, 0.0)
    h2 = jnp.maximum(h1 @ w2.T + b2, 0.0)
    return jax.nn.sigmoid(h2 @ w3.T + b3)


if __name__ == "__main__":
    key = jax.random.PRNGKey(0)
    k_x1, k_x2, k_p = jax.random.split(key, 3)

    num_frequencies = 6
    d_in = 2 * num_frequencies * 2 + 2   # = 26, as in the PyTorch __init__
    filter_size = 128
    d_out = 3

    params = init_params(k_p, d_in=d_in, filter_size=filter_size, d_out=d_out)

    # Small batch: single (boundary-masked) grid step.
    x1 = jax.random.normal(k_x1, (16, d_in), jnp.float32)
    out1 = jax.block_until_ready(model_2d_forward(x1, *params))
    ref1 = reference_forward(x1, *params)
    assert out1.shape == (16, d_out)
    assert bool(jnp.allclose(out1, ref1, atol=2e-2, rtol=2e-2)), "mismatch (small batch)"

    # Ragged batch, multiple grid steps (exercises the masked tail tile).
    x2 = jax.random.normal(k_x2, (300, d_in), jnp.float32)
    out2 = jax.block_until_ready(model_2d_forward(x2, *params, block_m=128))
    ref2 = reference_forward(x2, *params)
    assert out2.shape == (300, d_out)
    assert bool(jnp.allclose(out2, ref2, atol=2e-2, rtol=2e-2)), "mismatch (multi-tile)"

    print("KERNEL_OK")
</pallas_src>

<mosaic_0001>
module attributes {stable_mosaic.version = 11 : i64} {
  func.func @_mlp_kernel(%arg0: i32, %arg1: memref<128x26xf32, #tpu.memory_space<vmem>>, %arg2: memref<128x26xf32, #tpu.memory_space<vmem>>, %arg3: memref<128x1xf32, #tpu.memory_space<vmem>>, %arg4: memref<128x128xf32, #tpu.memory_space<vmem>>, %arg5: memref<128x1xf32, #tpu.memory_space<vmem>>, %arg6: memref<3x128xf32, #tpu.memory_space<vmem>>, %arg7: memref<3x1xf32, #tpu.memory_space<vmem>>, %arg8: memref<3x128xf32, #tpu.memory_space<vmem>>) attributes {dimension_semantics = [#tpu.dimension_semantics<parallel>], iteration_bounds = array<i64: 1>, scalar_prefetch = 0 : i64, scratch_operands = 0 : i64, tpu.core_type = #tpu.core_type<tc>, window_params = [{transform_indices = @transform_0, window_bounds = array<i64: 128, 26>}, {pipeline_mode = #tpu.pipeline_mode<synchronous>, transform_indices = @transform_1, window_bounds = array<i64: 128, 26>}, {pipeline_mode = #tpu.pipeline_mode<synchronous>, transform_indices = @transform_2, window_bounds = array<i64: 128, 1>}, {pipeline_mode = #tpu.pipeline_mode<synchronous>, transform_indices = @transform_3, window_bounds = array<i64: 128, 128>}, {pipeline_mode = #tpu.pipeline_mode<synchronous>, transform_indices = @transform_4, window_bounds = array<i64: 128, 1>}, {pipeline_mode = #tpu.pipeline_mode<synchronous>, transform_indices = @transform_5, window_bounds = array<i64: 3, 128>}, {pipeline_mode = #tpu.pipeline_mode<synchronous>, transform_indices = @transform_6, window_bounds = array<i64: 3, 1>}, {transform_indices = @transform_7, window_bounds = array<i64: 3, 128>}]} {
    %c0 = arith.constant 0 : index
    %c0_0 = arith.constant 0 : index
    %0 = vector.load %arg2[%c0, %c0_0] : memref<128x26xf32, #tpu.memory_space<vmem>>, vector<128x26xf32>
    %c0_1 = arith.constant 0 : index
    %c0_2 = arith.constant 0 : index
    %1 = vector.load %arg1[%c0_1, %c0_2] : memref<128x26xf32, #tpu.memory_space<vmem>>, vector<128x26xf32>
    %2 = tpu.transpose %1, [1, 0] : vector<128x26xf32> -> vector<26x128xf32>
    %cst = arith.constant dense<0.000000e+00> : vector<128x128xf32>
    %3 = tpu.matmul %0, %2, %cst {dimension_numbers = #tpu.dot_dimension_numbers<[1], [0], [0], [1], [0, 0, 1, 1], [], []>} : vector<128x26xf32>, vector<26x128xf32>, vector<128x128xf32> -> vector<128x128xf32>
    %c0_3 = arith.constant 0 : index
    %c0_4 = arith.constant 0 : index
    %4 = vector.load %arg3[%c0_3, %c0_4] : memref<128x1xf32, #tpu.memory_space<vmem>>, vector<128x1xf32>
    %5 = vector.broadcast %4 : vector<128x1xf32> to vector<128x128xf32>
    %6 = arith.addf %3, %5 : vector<128x128xf32>
    %cst_5 = arith.constant 0.000000e+00 : f32
    %7 = vector.broadcast %cst_5 : f32 to vector<128x128xf32>
    %8 = arith.maximumf %6, %7 : vector<128x128xf32>
    %c0_6 = arith.constant 0 : index
    %c0_7 = arith.constant 0 : index
    %9 = vector.load %arg4[%c0_6, %c0_7] : memref<128x128xf32, #tpu.memory_space<vmem>>, vector<128x128xf32>
    %cst_8 = arith.constant dense<0.000000e+00> : vector<128x128xf32>
    %10 = tpu.matmul %9, %8, %cst_8 {dimension_numbers = #tpu.dot_dimension_numbers<[1], [0], [0], [1], [0, 0, 1, 1], [], []>} : vector<128x128xf32>, vector<128x128xf32>, vector<128x128xf32> -> vector<128x128xf32>
    %c0_9 = arith.constant 0 : index
    %c0_10 = arith.constant 0 : index
    %11 = vector.load %arg5[%c0_9, %c0_10] : memref<128x1xf32, #tpu.memory_space<vmem>>, vector<128x1xf32>
    %12 = vector.broadcast %11 : vector<128x1xf32> to vector<128x128xf32>
    %13 = arith.addf %10, %12 : vector<128x128xf32>
    %cst_11 = arith.constant 0.000000e+00 : f32
    %14 = vector.broadcast %cst_11 : f32 to vector<128x128xf32>
    %15 = arith.maximumf %13, %14 : vector<128x128xf32>
    %c0_12 = arith.constant 0 : index
    %c0_13 = arith.constant 0 : index
    %16 = vector.load %arg6[%c0_12, %c0_13] : memref<3x128xf32, #tpu.memory_space<vmem>>, vector<3x128xf32>
    %cst_14 = arith.constant dense<0.000000e+00> : vector<3x128xf32>
    %17 = tpu.matmul %16, %15, %cst_14 {dimension_numbers = #tpu.dot_dimension_numbers<[1], [0], [0], [1], [0, 0, 1, 1], [], []>} : vector<3x128xf32>, vector<128x128xf32>, vector<3x128xf32> -> vector<3x128xf32>
    %c0_15 = arith.constant 0 : index
    %c0_16 = arith.constant 0 : index
    %18 = vector.load %arg7[%c0_15, %c0_16] : memref<3x1xf32, #tpu.memory_space<vmem>>, vector<3x1xf32>
    %19 = vector.broadcast %18 : vector<3x1xf32> to vector<3x128xf32>
    %20 = arith.addf %17, %19 : vector<3x128xf32>
    %21 = arith.negf %20 : vector<3x128xf32>
    %22 = math.exp %21 : vector<3x128xf32>
    %cst_17 = arith.constant 1.000000e+00 : f32
    %23 = vector.broadcast %cst_17 : f32 to vector<3x128xf32>
    %24 = arith.addf %23, %22 : vector<3x128xf32>
    %25 = arith.divf %23, %24 : vector<3x128xf32>
    %c0_18 = arith.constant 0 : index
    %c0_19 = arith.constant 0 : index
    %26 = vector.load %arg8[%c0_18, %c0_19] : memref<3x128xf32, #tpu.memory_space<vmem>>, vector<3x128xf32>
    tpu.vector_store %arg8[%c0_18, %c0_19], %25 {strides = array<i32>} : memref<3x128xf32, #tpu.memory_space<vmem>>, vector<3x128xf32>,
    return
  }
  func.func @transform_0(%arg0: i32) -> (i32, i32) {
    %c0_i32 = arith.constant 0 : i32
    %c0_i32_0 = arith.constant 0 : i32
    return %arg0, %c0_i32 : i32, i32
  }
  func.func @transform_1(%arg0: i32) -> (i32, i32) {
    %c0_i32 = arith.constant 0 : i32
    %c0_i32_0 = arith.constant 0 : i32
    %c0_i32_1 = arith.constant 0 : i32
    return %c0_i32, %c0_i32_0 : i32, i32
  }
  func.func @transform_2(%arg0: i32) -> (i32, i32) {
    %c0_i32 = arith.constant 0 : i32
    %c0_i32_0 = arith.constant 0 : i32
    %c0_i32_1 = arith.constant 0 : i32
    return %c0_i32, %c0_i32_0 : i32, i32
  }
  func.func @transform_3(%arg0: i32) -> (i32, i32) {
    %c0_i32 = arith.constant 0 : i32
    %c0_i32_0 = arith.constant 0 : i32
    %c0_i32_1 = arith.constant 0 : i32
    return %c0_i32, %c0_i32_0 : i32, i32
  }
  func.func @transform_4(%arg0: i32) -> (i32, i32) {
    %c0_i32 = arith.constant 0 : i32
    %c0_i32_0 = arith.constant 0 : i32
    %c0_i32_1 = arith.constant 0 : i32
    return %c0_i32, %c0_i32_0 : i32, i32
  }
  func.func @transform_5(%arg0: i32) -> (i32, i32) {
    %c0_i32 = arith.constant 0 : i32
    %c0_i32_0 = arith.constant 0 : i32
    %c0_i32_1 = arith.constant 0 : i32
    return %c0_i32, %c0_i32_0 : i32, i32
  }
  func.func @transform_6(%arg0: i32) -> (i32, i32) {
    %c0_i32 = arith.constant 0 : i32
    %c0_i32_0 = arith.constant 0 : i32
    %c0_i32_1 = arith.constant 0 : i32
    return %c0_i32, %c0_i32_0 : i32, i32
  }
  func.func @transform_7(%arg0: i32) -> (i32, i32) {
    %c0_i32 = arith.constant 0 : i32
    %c0_i32_0 = arith.constant 0 : i32
    return %c0_i32, %arg0 : i32, i32
  }
}

</mosaic_0001>

<bundles_post_ra>
// kernel: model_2d_forward.1
= control target key start
LH: loop header
LB: loop body
LE: loop exit
PB: predicated region body
PF: predicated region fallthrough
CT: control target
= control target key end

     0   :  { %vm155_vm0 = vcmask 211968   ;;  %v1077_v2 = vmov 0   ;;  %s1459_s0 = inlined_call_operand.vmem [shape: f32[16,26], index: 0, kind: input, shape index: {}]   ;;  %s1460_s1 = inlined_call_operand.vmem [shape: f32[128,26], index: 1, kind: input, shape index: {}]   ;;  %s1461_s2 = inlined_call_operand.vmem [shape: f32[128,1], index: 2, kind: input, shape index: {}]   ;;  %s1462_s3 = inlined_call_operand.vmem [shape: f32[128,128], index: 3, kind: input, shape index: {}]   ;;  %s1463_s4 = inlined_call_operand.vmem [shape: f32[128,1], index: 4, kind: input, shape index: {}]   ;;  %s1464_s5 = inlined_call_operand.vmem [shape: f32[3,128], index: 5, kind: input, shape index: {}]   ;;  %s1465_s6 = inlined_call_operand.vmem [shape: f32[3,1], index: 6, kind: input, shape index: {}]   ;;  %s1466_s7 = inlined_call_operand.hbm [shape: f32[3,16], index: 7, kind: output, shape index: {}]  }
   0x1   :  { %v58_v0 = vld [vmem:[%s1459_s0 + $0x78] sm:$0xff]  ;;  %v57_v1 = vld [vmem:[%s1459_s0 + $0x70] sm:$0xff]  ;;  %1049 = vset.pattern.permute.xlu0 %v1077_v2  ;;  %1050 = vset.pattern.permute.xlu1 %v1077_v2  ;;  %v56_v3 = vld [vmem:[%s1459_s0 + $0x68] sm:$0xff] }
   0x2   :  { %898 = vmatprep.subr.msk.mxu0 %vm155_vm0, %v58_v0  ;;  %v27_v4 = vld [vmem:[%s1460_s1] sm:$0xff]  ;;  %v74_v6 = vld [vmem:[%s1461_s2 + $0x78] sm:$0xff]  ;;  %v72_v7 = vld [vmem:[%s1461_s2 + $0x68] sm:$0xff] }
   0x3   :  { %899 = vmatpush3.xpose.msk.msra.mxu0 %vm155_vm0, %v58_v0  ;;  %930 = vmatprep.mubr.msk.f32.mxu0 %vm155_vm0, %v27_v4  ;;  %v55_v5 = vld [vmem:[%s1459_s0 + $0x60] sm:$0xff]  ;;  %v54_v8 = vld [vmem:[%s1459_s0 + $0x58] sm:$0xff]  ;;  %v73_v9 = vld [vmem:[%s1461_s2 + $0x70] sm:$0xff] }
   0x4   :  { %900 = vmatprep.subr.msk.mxu0 %vm155_vm0, %v57_v1  ;;  %152 = vperm.xlu0 %1049, %v74_v6   ;;  %v71_v10 = vld [vmem:[%s1461_s2 + $0x60] sm:$0xff]  ;;  %v53_v11 = vld [vmem:[%s1459_s0 + $0x50] sm:$0xff]  ;;  %v70_v12 = vld [vmem:[%s1461_s2 + $0x58] sm:$0xff] }
   0x5   :  { %142 = vperm.xlu1 %1050, %v72_v7   ;;  %v69_v13 = vld [vmem:[%s1461_s2 + $0x50] sm:$0xff]  ;;  %v52_v14 = vld [vmem:[%s1459_s0 + $0x48] sm:$0xff]  ;;  %v67_v16 = vld [vmem:[%s1461_s2 + $0x40] sm:$0xff] }
   0x6   :  { %v68_v15 = vld [vmem:[%s1461_s2 + $0x48] sm:$0xff] }
   0x7   :  { %901 = vmatpush3.xpose.msk.msra.mxu0 %vm155_vm0, %v57_v1 }
   0x8   :  { %902 = vmatprep.subr.msk.mxu0 %vm155_vm0, %v56_v3  ;;  %147 = vperm.xlu0 %1049, %v73_v9  }
   0x9   :  { %137 = vperm.xlu1 %1050, %v71_v10  }
   0xb   :  { %903 = vmatpush3.xpose.msk.msra.mxu0 %vm155_vm0, %v56_v3 }
   0xc   :  { %904 = vmatprep.subr.msk.mxu0 %vm155_vm0, %v55_v5  ;;  %132 = vperm.xlu0 %1049, %v70_v12  }
   0xd   :  { %127 = vperm.xlu1 %1050, %v69_v13  }
   0xf   :  { %905 = vmatpush3.xpose.msk.msra.mxu0 %vm155_vm0, %v55_v5 }
  0x10   :  { %906 = vmatprep.subr.msk.mxu0 %vm155_vm0, %v54_v8 }
  0x13   :  { %907 = vmatpush3.xpose.msk.msra.mxu0 %vm155_vm0, %v54_v8 }
  0x14   :  { %908 = vmatprep.subr.msk.mxu0 %vm155_vm0, %v53_v11 }
  0x15   :  { %12 = vsyncpa [#allocation3], 0  ;;  %122 = vperm.xlu0 %1049, %v68_v15   ;;  %v51_v17 = vld [vmem:[%s1459_s0 + $0x40] sm:$0xff]  ;;  %v66_v18 = vld [vmem:[%s1461_s2 + $0x38] sm:$0xff]  ;;  %117 = vperm.xlu1 %1050, %v67_v16   ;;  %vm1079_vm1 = vmmov 0   ;;  %s1080_s13 = smov [#allocation2]  }
  0x16   :  { %v65_v19 = vld [vmem:[%s1461_s2 + $0x30] sm:$0xff]  ;;  %v50_v20 = vld [vmem:[%s1459_s0 + $0x38] sm:$0xff]  ;;  %v64_v21 = vld [vmem:[%s1461_s2 + $0x28] sm:$0xff]  ;;  %s776_s14 = sshll.u32 %s1080_s13, 4  ;;  %s777_s14 = int_to_ptr.vmem [resolvable:$true] %s776_s14 }
  0x17   :  { %909 = vmatpush3.xpose.msk.msra.mxu0 %vm155_vm0, %v53_v11  ;;  %v63_v22 = vld [vmem:[%s1461_s2 + $0x20] sm:$0xff]  ;;  %v49_v23 = vld [vmem:[%s1459_s0 + $0x30] sm:$0xff]  ;;  %v62_v24 = vld [vmem:[%s1461_s2 + $0x18] sm:$0xff]  ;;  %s1055_s15 = scalar_lea.vmem %s777_s14, 64  ;;  %p1060_p1 = scmp.lt.s32.totalorder %s777_s14, %s777_s14 }
  0x18   :  { %910 = vmatprep.subr.msk.mxu0 %vm155_vm0, %v52_v14  ;;  %v61_v25 = vld [vmem:[%s1461_s2 + $0x10] sm:$0xff]  ;;  %v48_v26 = vld [vmem:[%s1459_s0 + $0x28] sm:$0xff]  ;;  %v59_v28 = vld [vmem:[%s1461_s2] sm:$0xff]  ;;  %p1056_p0 = scmp.ne.s32.totalorder %s777_s14, %s1055_s15  ;;  %p1061_p2 = scmp.lt.s32.totalorder %s1055_s15, %s1055_s15 }
  0x19   :  { %112 = vperm.xlu0 %1049, %v66_v18   ;;  %107 = vperm.xlu1 %1050, %v65_v19   ;;  %v60_v27 = vld [vmem:[%s1461_s2 + $0x8] sm:$0xff]  ;;  %v47_v29 = vld [vmem:[%s1459_s0 + $0x20] sm:$0xff]  ;;  %v444_v30 = vld [vmem:[%s1463_s4 + $0x78] sm:$0xff] }
  0x1a   :  { %v443_v31 = vld [vmem:[%s1463_s4 + $0x70] sm:$0xff]  ;;  %v46_v32 = vld [vmem:[%s1459_s0 + $0x18] sm:$0xff]  ;;  %v442_v33 = vld [vmem:[%s1463_s4 + $0x68] sm:$0xff]  ;;  %p1062_p3 = por %p1061_p2, %p1060_p1 }
  0x1b   :  { %911 = vmatpush3.xpose.msk.msra.mxu0 %vm155_vm0, %v52_v14  ;;  %v441_v34 = vld [vmem:[%s1463_s4 + $0x60] sm:$0xff]  ;;  %v45_v35 = vld [vmem:[%s1459_s0 + $0x10] sm:$0xff]  ;;  %v440_v36 = vld [vmem:[%s1463_s4 + $0x58] sm:$0xff] }
  0x1c   :  { %912 = vmatprep.subr.msk.mxu0 %vm155_vm0, %v51_v17  ;;  %v439_v37 = vld [vmem:[%s1463_s4 + $0x50] sm:$0xff]  ;;  %v44_v38 = vld [vmem:[%s1459_s0 + $0x8] sm:$0xff]  ;;  %v437_v40 = vld [vmem:[%s1463_s4 + $0x40] sm:$0xff]  ;;  %p1063_p4 = pnand %p1062_p3, %p1056_p0 }
  0x1d   :  { %102 = vperm.xlu0 %1049, %v64_v21   ;;  %97 = vperm.xlu1 %1050, %v63_v22   ;;  %v438_v39 = vld [vmem:[%s1463_s4 + $0x48] sm:$0xff]  ;;  %v43_v41 = vld [vmem:[%s1459_s0] sm:$0xff]  ;;  %v436_v42 = vld [vmem:[%s1463_s4 + $0x38] sm:$0xff] }
  0x1e   :  { %v435_v43 = vld [vmem:[%s1463_s4 + $0x30] sm:$0xff]  ;;  %v434_v44 = vld [vmem:[%s1463_s4 + $0x28] sm:$0xff]  ;;  %v433_v45 = vld [vmem:[%s1463_s4 + $0x20] sm:$0xff] }
  0x1f   :  { %913 = vmatpush3.xpose.msk.msra.mxu0 %vm155_vm0, %v51_v17  ;;  %v28_v46 = vld [vmem:[%s1460_s1 + $0x8] sm:$0xff]  ;;  %v29_v47 = vld [vmem:[%s1460_s1 + $0x10] sm:$0xff]  ;;  %v432_v48 = vld [vmem:[%s1463_s4 + $0x18] sm:$0xff] }
  0x20   :  { %914 = vmatprep.subr.msk.mxu0 %vm155_vm0, %v50_v20  ;;  %v431_v49 = vld [vmem:[%s1463_s4 + $0x10] sm:$0xff]  ;;  %v30_v50 = vld [vmem:[%s1460_s1 + $0x18] sm:$0xff]  ;;  %v31_v51 = vld [vmem:[%s1460_s1 + $0x20] sm:$0xff] }
  0x21   :  { %92 = vperm.xlu0 %1049, %v62_v24   ;;  %87 = vperm.xlu1 %1050, %v61_v25   ;;  %v430_v52 = vld [vmem:[%s1463_s4 + $0x8] sm:$0xff]  ;;  %v429_v53 = vld [vmem:[%s1463_s4] sm:$0xff]  ;;  %v33_v55 = vld [vmem:[%s1460_s1 + $0x30] sm:$0xff] }
  0x22   :  { %v32_v54 = vld [vmem:[%s1460_s1 + $0x28] sm:$0xff]  ;;  %v687_v56 = vld [vmem:[%s1465_s6] sm:$0x7]  ;;  %v34_v57 = vld [vmem:[%s1460_s1 + $0x38] sm:$0xff] }
  0x23   :  { %915 = vmatpush3.xpose.msk.msra.mxu0 %vm155_vm0, %v50_v20  ;;  %v35_v58 = vld [vmem:[%s1460_s1 + $0x40] sm:$0xff]  ;;  %v36_v59 = vld [vmem:[%s1460_s1 + $0x48] sm:$0xff]  ;;  %v37_v60 = vld [vmem:[%s1460_s1 + $0x50] sm:$0xff] }
  0x24   :  { %916 = vmatprep.subr.msk.mxu0 %vm155_vm0, %v49_v23  ;;  %v38_v61 = vld [vmem:[%s1460_s1 + $0x58] sm:$0xff]  ;;  %v39_v62 = vld [vmem:[%s1460_s1 + $0x60] sm:$0xff]  ;;  %v40_v63 = vld [vmem:[%s1460_s1 + $0x68] sm:$0xff] }
  0x25   :  { %82 = vperm.xlu0 %1049, %v60_v27   ;;  %77 = vperm.xlu1 %1050, %v59_v28   ;;  %v41_v0 = vld [vmem:[%s1460_s1 + $0x70] sm:$0xff]  ;;  %v42_v1 = vld [vmem:[%s1460_s1 + $0x78] sm:$0xff]  ;;  %v413_v2 = vld [vmem:[%s1462_s3] sm:$0xff] }
  0x26   :  { %986 = vmatprep.mubr.f32.mxu1 %v413_v2 }
  0x27   :  { %917 = vmatpush3.xpose.msk.msra.mxu0 %vm155_vm0, %v49_v23 }
  0x28   :  { %918 = vmatprep.subr.msk.mxu0 %vm155_vm0, %v48_v26 }
  0x29   :  { %522 = vperm.xlu0 %1049, %v444_v30   ;;  %517 = vperm.xlu1 %1050, %v443_v31  }
  0x2b   :  { %919 = vmatpush3.xpose.msk.msra.mxu0 %vm155_vm0, %v48_v26 }
  0x2c   :  { %920 = vmatprep.subr.msk.mxu0 %vm155_vm0, %v47_v29 }
  0x2d   :  { %512 = vperm.xlu0 %1049, %v442_v33   ;;  %507 = vperm.xlu1 %1050, %v441_v34  }
  0x2f   :  { %921 = vmatpush3.xpose.msk.msra.mxu0 %vm155_vm0, %v47_v29 }
  0x30   :  { %922 = vmatprep.subr.msk.mxu0 %vm155_vm0, %v46_v32 }
  0x31   :  { %502 = vperm.xlu0 %1049, %v440_v36   ;;  %497 = vperm.xlu1 %1050, %v439_v37  }
  0x33   :  { %923 = vmatpush3.xpose.msk.msra.mxu0 %vm155_vm0, %v46_v32 }
  0x34   :  { %924 = vmatprep.subr.msk.mxu0 %vm155_vm0, %v45_v35 }
  0x35   :  { %492 = vperm.xlu0 %1049, %v438_v39   ;;  %487 = vperm.xlu1 %1050, %v437_v40  }
  0x37   :  { %925 = vmatpush3.xpose.msk.msra.mxu0 %vm155_vm0, %v45_v35 }
  0x38   :  { %926 = vmatprep.subr.msk.mxu0 %vm155_vm0, %v44_v38 }
  0x39   :  { %482 = vperm.xlu0 %1049, %v436_v42   ;;  %477 = vperm.xlu1 %1050, %v435_v43  }
  0x3b   :  { %927 = vmatpush3.xpose.msk.msra.mxu0 %vm155_vm0, %v44_v38 }
  0x3c   :  { %928 = vmatprep.subr.msk.mxu0 %vm155_vm0, %v43_v41 }
  0x3d   :  { %472 = vperm.xlu0 %1049, %v434_v44   ;;  %467 = vperm.xlu1 %1050, %v433_v45  }
  0x3f   :  { %929 = vmatpush3.xpose.msk.msra.mxu0 %vm155_vm0, %v43_v41 }
  0x41   :  { %462 = vperm.xlu0 %1049, %v432_v48   ;;  %457 = vperm.xlu1 %1050, %v431_v49  }
  0x42   :  { %931 = vmatmul.mubr.msk.f32.vlgmr.msra.gmra.mxu0 %vm155_vm0, %v28_v46 }
  0x43   :  { %933 = vmatprep.mubr.msk.f32.mxu0 %vm155_vm0, %v29_v47 }
  0x45   :  { %452 = vperm.xlu0 %1049, %v430_v52   ;;  %447 = vperm.xlu1 %1050, %v429_v53  }
  0x46   :  { %934 = vmatmul.mubr.msk.f32.gmra.mxu0 %vm155_vm0, %v30_v50 }
  0x47   :  { %936 = vmatprep.mubr.msk.f32.mxu0 %vm155_vm0, %v31_v51 }
  0x49   :  { %690 = vperm.xlu0 %1049, %v687_v56  }
  0x4a   :  { %937 = vmatmul.mubr.msk.f32.gmra.mxu0 %vm155_vm0, %v32_v54 }
  0x4b   :  { %939 = vmatprep.mubr.msk.f32.mxu0 %vm155_vm0, %v33_v55 }
  0x4e   :  { %940 = vmatmul.mubr.msk.f32.gmra.mxu0 %vm155_vm0, %v34_v57 }
  0x4f   :  { %942 = vmatprep.mubr.msk.f32.mxu0 %vm155_vm0, %v35_v58 }
  0x52   :  { %943 = vmatmul.mubr.msk.f32.gmra.mxu0 %vm155_vm0, %v36_v59 }
  0x53   :  { %945 = vmatprep.mubr.msk.f32.mxu0 %vm155_vm0, %v37_v60 }
  0x56   :  { %946 = vmatmul.mubr.msk.f32.gmra.mxu0 %vm155_vm0, %v38_v61 }
  0x57   :  { %948 = vmatprep.mubr.msk.f32.mxu0 %vm155_vm0, %v39_v62 }
  0x5a   :  { %949 = vmatmul.mubr.msk.f32.gmra.mxu0 %vm155_vm0, %v40_v63 }
  0x5b   :  { %951 = vmatprep.mubr.msk.f32.mxu0 %vm155_vm0, %v41_v0 }
  0x5e   :  { %952 = vmatmul.mubr.msk.f32.gmra.mxu0 %vm155_vm0, %v42_v1 }
  0x7f   :  { %v153_v9 = vpop.permute.xlu0 %152 }
  0x80   :  { %v143_v11 = vpop.permute.xlu1 %142 }
  0x83   :  { %v148_v14 = vpop.permute.xlu0 %147 }
  0x84   :  { %v138_v16 = vpop.permute.xlu1 %137 }
  0x87   :  { %v133_v19 = vpop.permute.xlu0 %132 }
  0x88   :  { %v128_v21 = vpop.permute.xlu1 %127 }
  0x90   :  { %v123_v25 = vpop.permute.xlu0 %122  ;;  %v118_v30 = vpop.permute.xlu1 %117 }
  0x94   :  { %v113_v35 = vpop.permute.xlu0 %112  ;;  %v108_v38 = vpop.permute.xlu1 %107 }
  0x98   :  { %v103_v43 = vpop.permute.xlu0 %102  ;;  %v98_v46 = vpop.permute.xlu1 %97 }
  0x9c   :  { %v93_v51 = vpop.permute.xlu0 %92  ;;  %v88_v54 = vpop.permute.xlu1 %87 }
  0xa0   :  { %v83_v59 = vpop.permute.xlu0 %82  ;;  %v78_v62 = vpop.permute.xlu1 %77 }
 0x102   :  { %v1367_v3 = vpop.f32.mrf.mxu0 }
 0x103   :  { %v324_v60 = vadd.f32 %v1367_v3, %v83_v59  ;;  %v415_v3 = vld [vmem:[%s1462_s3 + $0x10] sm:$0xff] }
 0x104   :  { %v1369_v4 = vpop.f32.mrf.mxu0 }
 0x105   :  { %v319_v63 = vadd.f32 %v1369_v4, %v78_v62  ;;  %v398_v1 = vmax.f32 %v324_v60, 0.0  ;;  %v416_v4 = vld [vmem:[%s1462_s3 + $0x18] sm:$0xff] }
 0x106   :  { %v1371_v5 = vpop.f32.mrf.mxu0 }
 0x107   :  { %v334_v55 = vadd.f32 %v1371_v5, %v93_v51  ;;  %v397_v2 = vmax.f32 %v319_v63, 0.0  ;;  %v414_v5 = vld [vmem:[%s1462_s3 + $0x8] sm:$0xff] }
 0x108   :  { %v1373_v6 = vpop.f32.mrf.mxu0 }
 0x109   :  { %v329_v57 = vadd.f32 %v1373_v6, %v88_v54  ;;  %v400_v61 = vmax.f32 %v334_v55, 0.0  ;;  %v417_v6 = vld [vmem:[%s1462_s3 + $0x20] sm:$0xff] }
 0x10a   :  { %v938_v7 = vpop.f32.mrf.mxu0 }
 0x10b   :  { %v344_v49 = vadd.f32 %v938_v7, %v103_v43  ;;  %v399_v0 = vmax.f32 %v329_v57, 0.0  ;;  %v418_v7 = vld [vmem:[%s1462_s3 + $0x28] sm:$0xff] }
 0x10c   :  { %v338_v8 = vpop.f32.mrf.mxu0 }
 0x10d   :  { %v339_v52 = vadd.f32 %v338_v8, %v98_v46  ;;  %v402_v56 = vmax.f32 %v344_v49, 0.0  ;;  %v419_v8 = vld [vmem:[%s1462_s3 + $0x30] sm:$0xff] }
 0x10e   :  { %v941_v10 = vpop.f32.mrf.mxu0 }
 0x10f   :  { %v354_v44 = vadd.f32 %v941_v10, %v113_v35  ;;  %v401_v58 = vmax.f32 %v339_v52, 0.0  ;;  %v421_v10 = vld [vmem:[%s1462_s3 + $0x40] sm:$0xff] }
 0x110   :  { %v348_v12 = vpop.f32.mrf.mxu0 }
 0x111   :  { %v349_v47 = vadd.f32 %v348_v12, %v108_v38  ;;  %v404_v50 = vmax.f32 %v354_v44, 0.0  ;;  %v423_v12 = vld [vmem:[%s1462_s3 + $0x50] sm:$0xff] }
 0x112   :  { %v944_v13 = vpop.f32.mrf.mxu0 }
 0x113   :  { %v364_v39 = vadd.f32 %v944_v13, %v123_v25  ;;  %v403_v53 = vmax.f32 %v349_v47, 0.0  ;;  %v424_v13 = vld [vmem:[%s1462_s3 + $0x58] sm:$0xff]  ;;  %v523_v25 = vpop.permute.xlu0 %522 }
 0x114   :  { %v358_v15 = vpop.f32.mrf.mxu0 }
 0x115   :  { %v359_v41 = vadd.f32 %v358_v15, %v118_v30  ;;  %v406_v45 = vmax.f32 %v364_v39, 0.0  ;;  %v426_v15 = vld [vmem:[%s1462_s3 + $0x68] sm:$0xff] }
 0x116   :  { %v947_v17 = vpop.f32.mrf.mxu0 }
 0x117   :  { %v374_v33 = vadd.f32 %v947_v17, %v133_v19  ;;  %v405_v48 = vmax.f32 %v359_v41, 0.0  ;;  %v428_v17 = vld [vmem:[%s1462_s3 + $0x78] sm:$0xff]  ;;  %v513_v30 = vpop.permute.xlu0 %512 }
 0x118   :  { %v368_v18 = vpop.f32.mrf.mxu0 }
 0x119   :  { %v369_v36 = vadd.f32 %v368_v18, %v128_v21  ;;  %v408_v40 = vmax.f32 %v374_v33, 0.0  ;;  %v1078_v18 = vmov 0.0  }
 0x11a   :  { %v950_v20 = vpop.f32.mrf.mxu0 }
 0x11b   :  { %v384_v27 = vadd.f32 %v950_v20, %v143_v11  ;;  %v407_v42 = vmax.f32 %v369_v36, 0.0  ;;  %v422_v11 = vld [vmem:[%s1462_s3 + $0x48] sm:$0xff]  ;;  %v503_v35 = vpop.permute.xlu0 %502 }
 0x11c   :  { %v378_v22 = vpop.f32.mrf.mxu0 }
 0x11d   :  { %v379_v31 = vadd.f32 %v378_v22, %v138_v16  ;;  %v410_v34 = vmax.f32 %v384_v27, 0.0  ;;  %v427_v16 = vld [vmem:[%s1462_s3 + $0x70] sm:$0xff]  ;;  %v518_v27 = vpop.permute.xlu1 %517 }
 0x11e   :  { %v953_v23 = vpop.f32.mrf.mxu0 }
 0x11f   :  { %v394_v24 = vadd.f32 %v953_v23, %v153_v9  ;;  %v409_v37 = vmax.f32 %v379_v31, 0.0  ;;  %v420_v9 = vld [vmem:[%s1462_s3 + $0x38] sm:$0xff]  ;;  %v493_v41 = vpop.permute.xlu0 %492 }
 0x120   :  { %v388_v26 = vpop.f32.mrf.mxu0 }
 0x121   :  { %v412_v28 = vmax.f32 %v394_v24, 0.0  ;;  %v389_v29 = vadd.f32 %v388_v26, %v148_v14  ;;  %v425_v14 = vld [vmem:[%s1462_s3 + $0x60] sm:$0xff] }
 0x123   :  { %v411_v32 = vmax.f32 %v389_v29, 0.0  ;;  %954 = vmatprep.subr.mxu1 %v412_v28  ;;  %v483_v51 = vpop.permute.xlu0 %482 }
 0x124   :  { %955 = vmatpush3.msra.mxu1 %v412_v28 }
 0x125   :  { %956 = vmatprep.subr.mxu1 %v411_v32 }
 0x126   :  { %957 = vmatpush3.msra.mxu1 %v411_v32  ;;  %v508_v32 = vpop.permute.xlu1 %507 }
 0x127   :  { %958 = vmatprep.subr.mxu1 %v410_v34  ;;  %v473_v59 = vpop.permute.xlu0 %472 }
 0x128   :  { %959 = vmatpush3.msra.mxu1 %v410_v34 }
 0x129   :  { %960 = vmatprep.subr.mxu1 %v409_v37 }
 0x12a   :  { %961 = vmatpush3.msra.mxu1 %v409_v37  ;;  %v498_v37 = vpop.permute.xlu1 %497 }
 0x12b   :  { %962 = vmatprep.subr.mxu1 %v408_v40 }
 0x12c   :  { %963 = vmatpush3.msra.mxu1 %v408_v40 }
 0x12d   :  { %964 = vmatprep.subr.mxu1 %v407_v42 }
 0x12e   :  { %965 = vmatpush3.msra.mxu1 %v407_v42  ;;  %v488_v46 = vpop.permute.xlu1 %487 }
 0x12f   :  { %966 = vmatprep.subr.mxu1 %v406_v45 }
 0x130   :  { %967 = vmatpush3.msra.mxu1 %v406_v45 }
 0x131   :  { %968 = vmatprep.subr.mxu1 %v405_v48 }
 0x132   :  { %969 = vmatpush3.msra.mxu1 %v405_v48  ;;  %v478_v54 = vpop.permute.xlu1 %477 }
 0x133   :  { %970 = vmatprep.subr.mxu1 %v404_v50 }
 0x134   :  { %971 = vmatpush3.msra.mxu1 %v404_v50 }
 0x135   :  { %972 = vmatprep.subr.mxu1 %v403_v53 }
 0x136   :  { %973 = vmatpush3.msra.mxu1 %v403_v53  ;;  %v468_v62 = vpop.permute.xlu1 %467 }
 0x137   :  { %974 = vmatprep.subr.mxu1 %v402_v56 }
 0x138   :  { %975 = vmatpush3.msra.mxu1 %v402_v56 }
 0x139   :  { %976 = vmatprep.subr.mxu1 %v401_v58 }
 0x13a   :  { %977 = vmatpush3.msra.mxu1 %v401_v58 }
 0x13b   :  { %978 = vmatprep.subr.mxu1 %v400_v61 }
 0x13c   :  { %979 = vmatpush3.msra.mxu1 %v400_v61 }
 0x13d   :  { %980 = vmatprep.subr.mxu1 %v399_v0 }
 0x13e   :  { %981 = vmatpush3.msra.mxu1 %v399_v0 }
 0x13f   :  { %982 = vmatprep.subr.mxu1 %v398_v1 }
 0x140   :  { %983 = vmatpush3.msra.mxu1 %v398_v1 }
 0x141   :  { %984 = vmatprep.subr.mxu1 %v397_v2 }
 0x142   :  { %985 = vmatpush3.msra.mxu1 %v397_v2 }
 0x143   :  { %987 = vmatmul.mubr.f32.vlgmr.msra.gmra.mxu1 %v414_v5  ;;  %1010 = vmatprep.subr.mxu1 %v1078_v18  ;;  %v463_v5 = vpop.permute.xlu0 %462 }
 0x144   :  { %989 = vmatprep.mubr.f32.mxu1 %v415_v3 }
 0x147   :  { %990 = vmatmul.mubr.f32.gmra.mxu1 %v416_v4 }
 0x148   :  { %992 = vmatprep.mubr.f32.mxu1 %v417_v6  ;;  %v458_v6 = vpop.permute.xlu1 %457 }
 0x14b   :  { %993 = vmatmul.mubr.f32.gmra.mxu1 %v418_v7 }
 0x14c   :  { %995 = vmatprep.mubr.f32.mxu1 %v419_v8 }
 0x14f   :  { %996 = vmatmul.mubr.f32.gmra.mxu1 %v420_v9 }
 0x150   :  { %998 = vmatprep.mubr.f32.mxu1 %v421_v10 }
 0x153   :  { %999 = vmatmul.mubr.f32.gmra.mxu1 %v422_v11  ;;  %v453_v11 = vpop.permute.xlu0 %452 }
 0x154   :  { %1001 = vmatprep.mubr.f32.mxu1 %v423_v12 }
 0x157   :  { %1002 = vmatmul.mubr.f32.gmra.mxu1 %v424_v13 }
 0x158   :  { %1004 = vmatprep.mubr.f32.mxu1 %v425_v14  ;;  %v448_v14 = vpop.permute.xlu1 %447 }
 0x15b   :  { %1005 = vmatmul.mubr.f32.gmra.mxu1 %v426_v15 }
 0x15c   :  { %1007 = vmatprep.mubr.f32.mxu1 %v427_v16 }
 0x15f   :  { %1008 = vmatmul.mubr.f32.gmra.mxu1 %v428_v17 }
 0x160   :  { %1042 = vmatprep.mubr.msk.f32.mxu1 %vm1079_vm1, %v1078_v18 }
 0x203   :  { %v1426_v19 = vpop.f32.mrf.mxu1 }
 0x204   :  { %v597_v12 = vadd.f32 %v1426_v19, %v453_v11  ;;  %v686_v19 = vld [vmem:[%s1464_s5] sm:$0x7] }
 0x205   :  { %v1428_v20 = vpop.f32.mrf.mxu1 }
 0x206   :  { %v592_v15 = vadd.f32 %v1428_v20, %v448_v14  ;;  %v671_v17 = vmax.f32 %v597_v12, 0.0 }
 0x207   :  { %v1430_v21 = vpop.f32.mrf.mxu1 }
 0x208   :  { %v607_v7 = vadd.f32 %v1430_v21, %v463_v5  ;;  %v670_v21 = vmax.f32 %v592_v15, 0.0 }
 0x209   :  { %v1432_v22 = vpop.f32.mrf.mxu1 }
 0x20a   :  { %v602_v9 = vadd.f32 %v1432_v22, %v458_v6  ;;  %v673_v13 = vmax.f32 %v607_v7, 0.0  ;;  %v691_v22 = vpop.permute.xlu0 %690 }
 0x20b   :  { %v994_v23 = vpop.f32.mrf.mxu1 }
 0x20c   :  { %v617_v1 = vadd.f32 %v994_v23, %v473_v59  ;;  %v672_v16 = vmax.f32 %v602_v9, 0.0 }
 0x20d   :  { %v611_v24 = vpop.f32.mrf.mxu1 }
 0x20e   :  { %v612_v3 = vadd.f32 %v611_v24, %v468_v62  ;;  %v675_v8 = vmax.f32 %v617_v1, 0.0 }
 0x20f   :  { %v997_v26 = vpop.f32.mrf.mxu1 }
 0x210   :  { %v627_v60 = vadd.f32 %v997_v26, %v483_v51  ;;  %v674_v10 = vmax.f32 %v612_v3, 0.0 }
 0x211   :  { %v621_v28 = vpop.f32.mrf.mxu1 }
 0x212   :  { %v622_v63 = vadd.f32 %v621_v28, %v478_v54  ;;  %v677_v2 = vmax.f32 %v627_v60, 0.0 }
 0x213   :  { %v1000_v29 = vpop.f32.mrf.mxu1 }
 0x214   :  { %v637_v55 = vadd.f32 %v1000_v29, %v493_v41  ;;  %v676_v4 = vmax.f32 %v622_v63, 0.0 }
 0x215   :  { %v631_v31 = vpop.f32.mrf.mxu1 }
 0x216   :  { %v632_v57 = vadd.f32 %v631_v31, %v488_v46  ;;  %v679_v61 = vmax.f32 %v637_v55, 0.0 }
 0x217   :  { %v1003_v33 = vpop.f32.mrf.mxu1 }
 0x218   :  { %v647_v49 = vadd.f32 %v1003_v33, %v503_v35  ;;  %v678_v0 = vmax.f32 %v632_v57, 0.0 }
 0x219   :  { %v641_v34 = vpop.f32.mrf.mxu1 }
 0x21a   :  { %v642_v52 = vadd.f32 %v641_v34, %v498_v37  ;;  %v681_v56 = vmax.f32 %v647_v49, 0.0 }
 0x21b   :  { %v1006_v36 = vpop.f32.mrf.mxu1 }
 0x21c   :  { %v657_v43 = vadd.f32 %v1006_v36, %v513_v30  ;;  %v680_v58 = vmax.f32 %v642_v52, 0.0 }
 0x21d   :  { %v651_v38 = vpop.f32.mrf.mxu1 }
 0x21e   :  { %v652_v47 = vadd.f32 %v651_v38, %v508_v32  ;;  %v683_v50 = vmax.f32 %v657_v43, 0.0 }
 0x21f   :  { %v1009_v39 = vpop.f32.mrf.mxu1 }
 0x220   :  { %v667_v40 = vadd.f32 %v1009_v39, %v523_v25  ;;  %v682_v53 = vmax.f32 %v652_v47, 0.0 }
 0x221   :  { %v661_v42 = vpop.f32.mrf.mxu1 }
 0x222   :  { %v685_v44 = vmax.f32 %v667_v40, 0.0  ;;  %v662_v45 = vadd.f32 %v661_v42, %v518_v27 }
 0x224   :  { %v684_v48 = vmax.f32 %v662_v45, 0.0  ;;  %1011 = vmatpush3.msra.mxu1 %v685_v44 }
 0x225   :  { %1012 = vmatprep.subr.mxu1 %v1078_v18 }
 0x226   :  { %1013 = vmatpush3.msra.mxu1 %v684_v48 }
 0x227   :  { %1014 = vmatprep.subr.mxu1 %v1078_v18 }
 0x228   :  { %1015 = vmatpush3.msra.mxu1 %v683_v50 }
 0x229   :  { %1016 = vmatprep.subr.mxu1 %v1078_v18 }
 0x22a   :  { %1017 = vmatpush3.msra.mxu1 %v682_v53 }
 0x22b   :  { %1018 = vmatprep.subr.mxu1 %v1078_v18 }
 0x22c   :  { %1019 = vmatpush3.msra.mxu1 %v681_v56 }
 0x22d   :  { %1020 = vmatprep.subr.mxu1 %v1078_v18 }
 0x22e   :  { %1021 = vmatpush3.msra.mxu1 %v680_v58 }
 0x22f   :  { %1022 = vmatprep.subr.mxu1 %v1078_v18 }
 0x230   :  { %1023 = vmatpush3.msra.mxu1 %v679_v61 }
 0x231   :  { %1024 = vmatprep.subr.mxu1 %v1078_v18 }
 0x232   :  { %1025 = vmatpush3.msra.mxu1 %v678_v0 }
 0x233   :  { %1026 = vmatprep.subr.mxu1 %v1078_v18 }
 0x234   :  { %1027 = vmatpush3.msra.mxu1 %v677_v2 }
 0x235   :  { %1028 = vmatprep.subr.mxu1 %v1078_v18 }
 0x236   :  { %1029 = vmatpush3.msra.mxu1 %v676_v4 }
 0x237   :  { %1030 = vmatprep.subr.mxu1 %v1078_v18 }
 0x238   :  { %1031 = vmatpush3.msra.mxu1 %v675_v8 }
 0x239   :  { %1032 = vmatprep.subr.mxu1 %v1078_v18 }
 0x23a   :  { %1033 = vmatpush3.msra.mxu1 %v674_v10 }
 0x23b   :  { %1034 = vmatprep.subr.mxu1 %v1078_v18 }
 0x23c   :  { %1035 = vmatpush3.msra.mxu1 %v673_v13 }
 0x23d   :  { %1036 = vmatprep.subr.mxu1 %v1078_v18 }
 0x23e   :  { %1037 = vmatpush3.msra.mxu1 %v672_v16 }
 0x23f   :  { %1038 = vmatprep.subr.mxu1 %v1078_v18 }
 0x240   :  { %1039 = vmatpush3.msra.mxu1 %v671_v17 }
 0x241   :  { %1040 = vmatprep.subr.mxu1 %v1078_v18 }
 0x242   :  { %1041 = vmatpush3.msra.mxu1 %v670_v21 }
 0x243   :  { %1043 = vmatmul.mubr.f32.vlgmr.msra.gmra.mxu1 %v686_v19 }
 0x303   :  { %v759_v20 = vpop.f32.mrf.mxu1 }
 0x304   :  { %v760_v23 = vadd.f32 %v759_v20, %v691_v22 }
 0x305   :  { %v1044_v24 = vpop.f32.mrf.mxu1 }
 0x306   :  { %v816_v25 = vmul.f32 -1.442695, %v760_v23 }
 0x308   :  { %1051 = vpow2.f32 %v816_v25 }
 0x315   :  { %v1052_v26 = vpop.eup %1051 }
 0x316   :  { %v766_v27 = vadd.f32 1.0, %v1052_v26 }
 0x318   :  { %1053 = vrcp.f32 %v766_v27 }
 0x325   :  { %v1054_v28 = vpop.eup %1053 }
 0x326   :  { %769 = vst [vmem:[#allocation2] sm:$0x7] %v1054_v28 }
 0x327   :  { %1066 = shalt.err (!%p1063_p4)
}
 0x328   :  { %779 = dma.vmem_to_hbm [thread:$0]  %s777_s14, 64, %s1466_s7, [#allocation3]  }
 0x329   :  { %1075 = dma.done.wait [#allocation3], 64  }
 0x32a   :  { %1076 = vsyncadd [#allocation3], 4294967232 }
 0x32b   :  { %783 = vsyncpa [#allocation3], 1 }

</bundles_post_ra>
